<compile_context>
chip_gen: v7x
topology: tpu7x:2x2x1
jax: 0.10.0
libtpu: 0.0.40
codegen_flags: <defaults>
</compile_context>

<pallas_src>
import functools

import jax
import jax.numpy as jnp
from jax.experimental import pallas as pl
from jax.experimental.pallas import tpu as pltpu


# ----------------------------------------------------------------------------
# Fused image-path kernel
#   grid = (B, num_strips); per step: one strip of one batch element.
#   patches tile -> img3 tile -> img4 tile (all VMEM only), strip max stored
#   directly into its output row, running global maxes kept in VMEM scratch.
# ----------------------------------------------------------------------------
def _img_fused_kernel(p_ref, w3_ref, b3_ref, w4_ref, b4_ref, o_ref,
                      f3_acc, f4_acc, *, num_strips):
    s = pl.program_id(1)
    c3 = w3_ref.shape[1]
    c4 = w4_ref.shape[1]

    x = p_ref[0]                                                  # (rows, D) bf16
    x3 = jnp.dot(x, w3_ref[...], preferred_element_type=jnp.float32)
    x3 = jnp.maximum(x3 + b3_ref[...], 0.0)                       # (rows, C3) f32
    x4 = jnp.dot(x3.astype(w4_ref.dtype), w4_ref[...],
                 preferred_element_type=jnp.float32)
    x4 = jnp.maximum(x4 + b4_ref[...], 0.0)                       # (rows, C4) f32

    strip_max = jnp.max(x4, axis=0, keepdims=True)                # (1, C4)
    f3_tile = jnp.max(x3, axis=0, keepdims=True)                  # (1, C3)

    @pl.when(s == 0)
    def _():
        f3_acc[...] = jnp.full_like(f3_acc, -jnp.inf)
        f4_acc[...] = jnp.full_like(f4_acc, -jnp.inf)

    f3_acc[...] = jnp.maximum(f3_acc[...], f3_tile)
    f4_acc[...] = jnp.maximum(f4_acc[...], strip_max)

    # Direct (predicated, static) store of this strip's max into its row.
    for k in range(num_strips):
        @pl.when(s == k)
        def _(k=k):
            o_ref[:, k:k + 1, :] = strip_max.reshape(1, 1, c4)

    @pl.when(s == num_strips - 1)
    def _():
        # row 6 = global max over img4 (img_f4)
        o_ref[:, num_strips:num_strips + 1, :] = f4_acc[...].reshape(1, 1, c4)
        # row 7 = img_f3 packed into the first C3 lanes (lane-dense store)
        if c3 < c4:
            row = jnp.concatenate(
                [f3_acc[...], jnp.zeros((1, c4 - c3), jnp.float32)], axis=-1)
        else:
            row = f3_acc[...]
        o_ref[:, num_strips + 1:num_strips + 2, :] = row.reshape(1, 1, c4)


def fused_image_head(patches_bf16, w3, b3, w4, b4, *, num_strips):
    B, HW, D = patches_bf16.shape
    C3 = w3.shape[1]
    C4 = w4.shape[1]
    assert HW % num_strips == 0
    rows = HW // num_strips
    kern = functools.partial(_img_fused_kernel, num_strips=num_strips)
    return pl.pallas_call(
        kern,
        out_shape=jax.ShapeDtypeStruct((B, num_strips + 2, C4), jnp.float32),
        grid_spec=pltpu.PrefetchScalarGridSpec(
            num_scalar_prefetch=0,
            grid=(B, num_strips),
            in_specs=[
                pl.BlockSpec((1, rows, D), lambda b, s: (b, s, 0)),
                pl.BlockSpec((D, C3), lambda b, s: (0, 0)),
                pl.BlockSpec((1, C3), lambda b, s: (0, 0)),
                pl.BlockSpec((C3, C4), lambda b, s: (0, 0)),
                pl.BlockSpec((1, C4), lambda b, s: (0, 0)),
            ],
            out_specs=pl.BlockSpec((1, num_strips + 2, C4),
                                   lambda b, s: (b, 0, 0)),
            scratch_shapes=[
                pltpu.VMEM((1, C3), jnp.float32),   # running img_f3 max
                pltpu.VMEM((1, C4), jnp.float32),   # running img_f4 max
            ],
        ),
        compiler_params=pltpu.CompilerParams(
            dimension_semantics=("parallel", "arbitrary"),
            vmem_limit_bytes=32 * 1024 * 1024),
    )(patches_bf16, w3, b3, w4, b4)


# ----------------------------------------------------------------------------
# Fused text-path kernel
#   grid = (B,); per step: whole sequence of one batch element.
#   txt3 head + its global max, plus ONE wide matmul for all 6 branch heads
#   (weights concatenated along N), per-branch max over L and cross-branch max.
# ----------------------------------------------------------------------------
def _txt_fused_kernel(e_ref, w3_ref, b3_ref, w4_ref, b4_ref, o_ref,
                      *, num_branches):
    c3 = w3_ref.shape[1]
    c4 = o_ref.shape[2]

    x = e_ref[0]                                                  # (L, D) bf16
    x3 = jnp.dot(x, w3_ref[...], preferred_element_type=jnp.float32)
    x3 = jnp.maximum(x3 + b3_ref[...], 0.0)                       # (L, C3) f32
    f3 = jnp.max(x3, axis=0, keepdims=True)                       # (1, C3)

    y = jnp.dot(x, w4_ref[...], preferred_element_type=jnp.float32)
    y = jnp.maximum(y + b4_ref[...], 0.0)                         # (L, nb*C4) f32

    f4 = None
    for k in range(num_branches):
        bk = jnp.max(y[:, k * c4:(k + 1) * c4], axis=0, keepdims=True)  # (1, C4)
        o_ref[:, k:k + 1, :] = bk.reshape(1, 1, c4)
        f4 = bk if f4 is None else jnp.maximum(f4, bk)

    o_ref[:, num_branches:num_branches + 1, :] = f4.reshape(1, 1, c4)
    if c3 < c4:
        row = jnp.concatenate([f3, jnp.zeros((1, c4 - c3), jnp.float32)],
                              axis=-1)
    else:
        row = f3
    o_ref[:, num_branches + 1:num_branches + 2, :] = row.reshape(1, 1, c4)


def fused_text_head(emb_bf16, w3, b3, w4cat, b4cat, *, num_branches):
    B, L, D = emb_bf16.shape
    C3 = w3.shape[1]
    C4 = w4cat.shape[1] // num_branches
    kern = functools.partial(_txt_fused_kernel, num_branches=num_branches)
    return pl.pallas_call(
        kern,
        out_shape=jax.ShapeDtypeStruct((B, num_branches + 2, C4), jnp.float32),
        grid_spec=pltpu.PrefetchScalarGridSpec(
            num_scalar_prefetch=0,
            grid=(B,),
            in_specs=[
                pl.BlockSpec((1, L, D), lambda b: (b, 0, 0)),
                pl.BlockSpec((D, C3), lambda b: (0, 0)),
                pl.BlockSpec((1, C3), lambda b: (0, 0)),
                pl.BlockSpec((D, num_branches * C4), lambda b: (0, 0)),
                pl.BlockSpec((1, num_branches * C4), lambda b: (0, 0)),
            ],
            out_specs=pl.BlockSpec((1, num_branches + 2, C4),
                                   lambda b: (b, 0, 0)),
        ),
        compiler_params=pltpu.CompilerParams(
            dimension_semantics=("parallel",),
            vmem_limit_bytes=32 * 1024 * 1024),
    )(emb_bf16, w3, b3, w4cat, b4cat)


# ----------------------------------------------------------------------------
# Network forward
# ----------------------------------------------------------------------------
NUM_STRIPS = 6


def network_forward_packed(params, img, txt_ids, mask):
    """Returns one lane-dense (B, 8, C4) slab per modality.

    rows 0..5 : per-strip / per-branch maxes, row 6 : global max (f4),
    row 7     : f3 packed into the first C3 lanes.
    """
    B, Ci, Hi, Wi = img.shape

    # ---- image backbone stand-in ------------------------------------------
    # TODO(synk): the real model is a pretrained ResNet-50 (layer4 stride 1);
    # here a deterministic space-to-depth patchify plus two fused
    # matmul+bias+ReLU ("1x1-conv") stages stand in for base1..base4.
    P = 4
    H, W = Hi // P, Wi // P
    assert H % NUM_STRIPS == 0, "strips must be contiguous H-row blocks"
    patches = (img.reshape(B, Ci, H, P, W, P)
                  .transpose(0, 2, 4, 1, 3, 5)
                  .reshape(B, H * W, Ci * P * P))
    img_slab = fused_image_head(
        patches.astype(jnp.bfloat16),
        params["img_w3"].astype(jnp.bfloat16),
        params["img_b3"].reshape(1, -1),
        params["img_w4"].astype(jnp.bfloat16),
        params["img_b4"].reshape(1, -1),
        num_strips=NUM_STRIPS)

    # ---- text path stand-in -------------------------------------------------
    # TODO(synk): frozen bert-base-chinese encoder replaced by a deterministic
    # embedding lookup gated by the attention mask; ResNet_text_50 (definition
    # not provided) txt3 / txt4x branches modeled as fused 1x1-conv heads.
    emb = params["txt_embed"][txt_ids] * mask[..., None].astype(jnp.float32)
    nb, D_emb, C4 = params["txt_w4"].shape
    w4cat = jnp.transpose(params["txt_w4"], (1, 0, 2)).reshape(D_emb, nb * C4)
    b4cat = params["txt_b4"].reshape(1, nb * C4)
    txt_slab = fused_text_head(
        emb.astype(jnp.bfloat16),
        params["txt_w3"].astype(jnp.bfloat16),
        params["txt_b3"].reshape(1, -1),
        w4cat.astype(jnp.bfloat16),
        b4cat,
        num_branches=nb)

    return img_slab, txt_slab


def unpack_outputs(img_slab, txt_slab, c3):
    """Training-mode 16-tuple of Network.forward, sliced lazily from the slabs."""
    img_f3 = img_slab[:, NUM_STRIPS + 1, :c3]
    img_f4 = img_slab[:, NUM_STRIPS, :]
    img_parts = tuple(img_slab[:, k, :] for k in range(NUM_STRIPS))
    txt_f3 = txt_slab[:, NUM_STRIPS + 1, :c3]
    txt_f4 = txt_slab[:, NUM_STRIPS, :]
    txt_parts = tuple(txt_slab[:, k, :] for k in range(NUM_STRIPS))
    return (img_f3, img_f4, *img_parts, txt_f3, txt_f4, *txt_parts)


def network_forward(params, img, txt_ids, mask):
    img_slab, txt_slab = network_forward_packed(params, img, txt_ids, mask)
    return unpack_outputs(img_slab, txt_slab, params["img_w3"].shape[1])


# ----------------------------------------------------------------------------
# Pure-jnp reference (same bf16 matmul operands, f32 accumulation/epilogue)
# ----------------------------------------------------------------------------
def _reference(params, img, txt_ids, mask):
    B, Ci, Hi, Wi = img.shape
    P = 4
    H, W = Hi // P, Wi // P
    patches = (img.reshape(B, Ci, H, P, W, P)
                  .transpose(0, 2, 4, 1, 3, 5)
                  .reshape(B, H * W, Ci * P * P))
    pb = patches.astype(jnp.bfloat16)
    img3 = jax.nn.relu(
        jnp.einsum("bsd,dc->bsc", pb, params["img_w3"].astype(jnp.bfloat16),
                   preferred_element_type=jnp.float32) + params["img_b3"])
    img4 = jax.nn.relu(
        jnp.einsum("bsc,ce->bse", img3.astype(jnp.bfloat16),
                   params["img_w4"].astype(jnp.bfloat16),
                   preferred_element_type=jnp.float32) + params["img_b4"])
    img_f3 = img3.max(axis=1)
    strips = img4.reshape(B, 6, (H * W) // 6, -1).max(axis=2)
    img_f4 = strips.max(axis=1)

    emb = params["txt_embed"][txt_ids] * mask[..., None].astype(jnp.float32)
    eb = emb.astype(jnp.bfloat16)
    txt3 = jax.nn.relu(
        jnp.einsum("bld,dc->blc", eb, params["txt_w3"].astype(jnp.bfloat16),
                   preferred_element_type=jnp.float32) + params["txt_b3"])
    txt_f3 = txt3.max(axis=1)
    branches = jnp.stack(
        [jax.nn.relu(
            jnp.einsum("bld,dc->blc", eb,
                       params["txt_w4"][k].astype(jnp.bfloat16),
                       preferred_element_type=jnp.float32)
            + params["txt_b4"][k]).max(axis=1)
         for k in range(6)],
        axis=1)
    txt_f4 = branches.max(axis=1)
    return img_f3, img_f4, strips, txt_f3, txt_f4, branches


if __name__ == "__main__":
    key = jax.random.PRNGKey(0)
    k_img, k_txt, k_p = jax.random.split(key, 3)

    # Small shapes: B=2, image 3x96x32 -> feature map 24x8 (6 strips of 4 rows),
    # seq L=8; reduced channel widths C3=64 ("1024"), C4=128 ("2048").
    B, Ci, Hi, Wi = 2, 3, 96, 32
    L, VOCAB, D_EMB = 8, 100, 32
    C3, C4 = 64, 128
    D_PATCH = Ci * 4 * 4

    img = jax.random.normal(k_img, (B, Ci, Hi, Wi), jnp.float32)
    txt_ids = jax.random.randint(k_txt, (B, L), 0, VOCAB)
    mask = jnp.ones((B, L), jnp.int32).at[:, L - 2:].set(0)

    ks = jax.random.split(k_p, 5)
    params = {
        "img_w3": jax.random.normal(ks[0], (D_PATCH, C3), jnp.float32) * 0.05,
        "img_b3": jnp.zeros((C3,), jnp.float32),
        "img_w4": jax.random.normal(ks[1], (C3, C4), jnp.float32) * 0.05,
        "img_b4": jnp.zeros((C4,), jnp.float32),
        "txt_embed": jax.random.normal(ks[2], (VOCAB, D_EMB), jnp.float32) * 0.05,
        "txt_w3": jax.random.normal(ks[3], (D_EMB, C3), jnp.float32) * 0.05,
        "txt_b3": jnp.zeros((C3,), jnp.float32),
        "txt_w4": jax.random.normal(ks[4], (6, D_EMB, C4), jnp.float32) * 0.05,
        "txt_b4": jnp.zeros((6, 1, C4), jnp.float32),
    }

    fwd = jax.jit(network_forward_packed)
    img_slab, txt_slab = jax.block_until_ready(fwd(params, img, txt_ids, mask))
    outs = unpack_outputs(img_slab, txt_slab, C3)

    # Validate against a pure-jnp reference.
    r_img_f3, r_img_f4, r_strips, r_txt_f3, r_txt_f4, r_branches = _reference(
        params, img, txt_ids, mask)
    (img_f3, img_f4, img_f41, img_f42, img_f43, img_f44, img_f45, img_f46,
     txt_f3, txt_f4, txt_f41, txt_f42, txt_f43, txt_f44, txt_f45, txt_f46) = outs

    tol = dict(atol=1e-3, rtol=1e-3)
    assert jnp.allclose(img_f3, r_img_f3, **tol)
    assert jnp.allclose(img_f4, r_img_f4, **tol)
    for k, v in enumerate([img_f41, img_f42, img_f43, img_f44, img_f45, img_f46]):
        assert jnp.allclose(v, r_strips[:, k, :], **tol)
    assert jnp.allclose(txt_f3, r_txt_f3, **tol)
    assert jnp.allclose(txt_f4, r_txt_f4, **tol)
    for k, v in enumerate([txt_f41, txt_f42, txt_f43, txt_f44, txt_f45, txt_f46]):
        assert jnp.allclose(v, r_branches[:, k, :], **tol)

    print("KERNEL_OK")
</pallas_src>

<mosaic_0001>
module attributes {stable_mosaic.version = 11 : i64} {
  func.func @_img_fused_kernel(%arg0: i32, %arg1: i32, %arg2: memref<1x32x48xbf16, #tpu.memory_space<vmem>>, %arg3: memref<48x64xbf16, #tpu.memory_space<vmem>>, %arg4: memref<1x64xf32, #tpu.memory_space<vmem>>, %arg5: memref<64x128xbf16, #tpu.memory_space<vmem>>, %arg6: memref<1x128xf32, #tpu.memory_space<vmem>>, %arg7: memref<1x8x128xf32, #tpu.memory_space<vmem>>, %arg8: memref<1x64xf32, #tpu.memory_space<vmem>>, %arg9: memref<1x128xf32, #tpu.memory_space<vmem>>) attributes {dimension_semantics = [#tpu.dimension_semantics<parallel>, #tpu.dimension_semantics<arbitrary>], iteration_bounds = array<i64: 2, 6>, scalar_prefetch = 0 : i64, scratch_operands = 2 : i64, tpu.core_type = #tpu.core_type<tc>, window_params = [{transform_indices = @transform_0, window_bounds = array<i64: 1, 32, 48>}, {pipeline_mode = #tpu.pipeline_mode<synchronous>, transform_indices = @transform_1, window_bounds = array<i64: 48, 64>}, {pipeline_mode = #tpu.pipeline_mode<synchronous>, transform_indices = @transform_2, window_bounds = array<i64: 1, 64>}, {pipeline_mode = #tpu.pipeline_mode<synchronous>, transform_indices = @transform_3, window_bounds = array<i64: 64, 128>}, {pipeline_mode = #tpu.pipeline_mode<synchronous>, transform_indices = @transform_4, window_bounds = array<i64: 1, 128>}, {transform_indices = @transform_5, window_bounds = array<i64: 1, 8, 128>}]} {
    %c0 = arith.constant 0 : index
    %c0_0 = arith.constant 0 : index
    %c0_1 = arith.constant 0 : index
    %0 = vector.load %arg2[%c0, %c0_0, %c0_1] : memref<1x32x48xbf16, #tpu.memory_space<vmem>>, vector<1x32x48xbf16>
    %1 = vector.shape_cast %0 : vector<1x32x48xbf16> to vector<32x48xbf16>
    %c0_2 = arith.constant 0 : index
    %c0_3 = arith.constant 0 : index
    %2 = vector.load %arg3[%c0_2, %c0_3] : memref<48x64xbf16, #tpu.memory_space<vmem>>, vector<48x64xbf16>
    %cst = arith.constant dense<0.000000e+00> : vector<32x64xf32>
    %3 = tpu.matmul %1, %2, %cst {dimension_numbers = #tpu.dot_dimension_numbers<[1], [0], [0], [1], [0, 0, 1, 1], [], []>} : vector<32x48xbf16>, vector<48x64xbf16>, vector<32x64xf32> -> vector<32x64xf32>
    %c0_4 = arith.constant 0 : index
    %c0_5 = arith.constant 0 : index
    %4 = vector.load %arg4[%c0_4, %c0_5] : memref<1x64xf32, #tpu.memory_space<vmem>>, vector<1x64xf32>
    %5 = vector.broadcast %4 : vector<1x64xf32> to vector<32x64xf32>
    %6 = arith.addf %3, %5 : vector<32x64xf32>
    %cst_6 = arith.constant 0.000000e+00 : f32
    %7 = vector.broadcast %cst_6 : f32 to vector<32x64xf32>
    %8 = arith.maximumf %6, %7 : vector<32x64xf32>
    %9 = arith.truncf %8 : vector<32x64xf32> to vector<32x64xbf16>
    %c0_7 = arith.constant 0 : index
    %c0_8 = arith.constant 0 : index
    %10 = vector.load %arg5[%c0_7, %c0_8] : memref<64x128xbf16, #tpu.memory_space<vmem>>, vector<64x128xbf16>
    %cst_9 = arith.constant dense<0.000000e+00> : vector<32x128xf32>
    %11 = tpu.matmul %9, %10, %cst_9 {dimension_numbers = #tpu.dot_dimension_numbers<[1], [0], [0], [1], [0, 0, 1, 1], [], []>} : vector<32x64xbf16>, vector<64x128xbf16>, vector<32x128xf32> -> vector<32x128xf32>
    %c0_10 = arith.constant 0 : index
    %c0_11 = arith.constant 0 : index
    %12 = vector.load %arg6[%c0_10, %c0_11] : memref<1x128xf32, #tpu.memory_space<vmem>>, vector<1x128xf32>
    %13 = vector.broadcast %12 : vector<1x128xf32> to vector<32x128xf32>
    %14 = arith.addf %11, %13 : vector<32x128xf32>
    %cst_12 = arith.constant 0.000000e+00 : f32
    %15 = vector.broadcast %cst_12 : f32 to vector<32x128xf32>
    %16 = arith.maximumf %14, %15 : vector<32x128xf32>
    %cst_13 = arith.constant dense<0xFF800000> : vector<128xf32>
    %17 = vector.multi_reduction <maximumf>, %16, %cst_13 [0] : vector<32x128xf32> to vector<128xf32>
    %18 = vector.shape_cast %17 : vector<128xf32> to vector<1x128xf32>
    %cst_14 = arith.constant dense<0xFF800000> : vector<64xf32>
    %19 = vector.multi_reduction <maximumf>, %8, %cst_14 [0] : vector<32x64xf32> to vector<64xf32>
    %20 = vector.shape_cast %19 : vector<64xf32> to vector<1x64xf32>
    %c0_i32 = arith.constant 0 : i32
    %21 = arith.cmpi eq, %arg1, %c0_i32 : i32
    %22 = arith.extui %21 : i1 to i32
    %c0_i32_15 = arith.constant 0 : i32
    %23 = arith.cmpi ne, %22, %c0_i32_15 : i32
    scf.if %23 {
      %cst_33 = arith.constant 0xFF800000 : f32
      %51 = vector.broadcast %cst_33 : f32 to vector<1x64xf32>
      %c0_34 = arith.constant 0 : index
      %c0_35 = arith.constant 0 : index
      %52 = vector.load %arg8[%c0_34, %c0_35] : memref<1x64xf32, #tpu.memory_space<vmem>>, vector<1x64xf32>
      tpu.vector_store %arg8[%c0_34, %c0_35], %51 {strides = array<i32>} : memref<1x64xf32, #tpu.memory_space<vmem>>, vector<1x64xf32>,
      %cst_36 = arith.constant 0xFF800000 : f32
      %53 = vector.broadcast %cst_36 : f32 to vector<1x128xf32>
      %c0_37 = arith.constant 0 : index
      %c0_38 = arith.constant 0 : index
      %54 = vector.load %arg9[%c0_37, %c0_38] : memref<1x128xf32, #tpu.memory_space<vmem>>, vector<1x128xf32>
      tpu.vector_store %arg9[%c0_37, %c0_38], %53 {strides = array<i32>} : memref<1x128xf32, #tpu.memory_space<vmem>>, vector<1x128xf32>,
    } else {
    }
    %c0_16 = arith.constant 0 : index
    %c0_17 = arith.constant 0 : index
    %24 = vector.load %arg8[%c0_16, %c0_17] : memref<1x64xf32, #tpu.memory_space<vmem>>, vector<1x64xf32>
    %25 = arith.maximumf %24, %20 : vector<1x64xf32>
    %c0_18 = arith.constant 0 : index
    %c0_19 = arith.constant 0 : index
    %26 = vector.load %arg8[%c0_18, %c0_19] : memref<1x64xf32, #tpu.memory_space<vmem>>, vector<1x64xf32>
    tpu.vector_store %arg8[%c0_18, %c0_19], %25 {strides = array<i32>} : memref<1x64xf32, #tpu.memory_space<vmem>>, vector<1x64xf32>,
    %c0_20 = arith.constant 0 : index
    %c0_21 = arith.constant 0 : index
    %27 = vector.load %arg9[%c0_20, %c0_21] : memref<1x128xf32, #tpu.memory_space<vmem>>, vector<1x128xf32>
    %28 = arith.maximumf %27, %18 : vector<1x128xf32>
    %c0_22 = arith.constant 0 : index
    %c0_23 = arith.constant 0 : index
    %29 = vector.load %arg9[%c0_22, %c0_23] : memref<1x128xf32, #tpu.memory_space<vmem>>, vector<1x128xf32>
    tpu.vector_store %arg9[%c0_22, %c0_23], %28 {strides = array<i32>} : memref<1x128xf32, #tpu.memory_space<vmem>>, vector<1x128xf32>,
    %c0_i32_24 = arith.constant 0 : i32
    %30 = arith.cmpi eq, %arg1, %c0_i32_24 : i32
    %31 = arith.extui %30 : i1 to i32
    %c0_i32_25 = arith.constant 0 : i32
    %32 = arith.cmpi ne, %31, %c0_i32_25 : i32
    scf.if %32 {
      %51 = vector.shape_cast %18 : vector<1x128xf32> to vector<1x1x128xf32>
      %c0_33 = arith.constant 0 : index
      %c0_34 = arith.constant 0 : index
      %c0_35 = arith.constant 0 : index
      %52 = vector.load %arg7[%c0_33, %c0_34, %c0_35] : memref<1x8x128xf32, #tpu.memory_space<vmem>>, vector<1x1x128xf32>
      tpu.vector_store %arg7[%c0_33, %c0_34, %c0_35], %51 {strides = array<i32>} : memref<1x8x128xf32, #tpu.memory_space<vmem>>, vector<1x1x128xf32>,
    } else {
    }
    %c1_i32 = arith.constant 1 : i32
    %33 = arith.cmpi eq, %arg1, %c1_i32 : i32
    %34 = arith.extui %33 : i1 to i32
    %c0_i32_26 = arith.constant 0 : i32
    %35 = arith.cmpi ne, %34, %c0_i32_26 : i32
    scf.if %35 {
      %51 = vector.shape_cast %18 : vector<1x128xf32> to vector<1x1x128xf32>
      %c0_33 = arith.constant 0 : index
      %c1 = arith.constant 1 : index
      %c0_34 = arith.constant 0 : index
      %52 = vector.load %arg7[%c0_33, %c1, %c0_34] : memref<1x8x128xf32, #tpu.memory_space<vmem>>, vector<1x1x128xf32>
      tpu.vector_store %arg7[%c0_33, %c1, %c0_34], %51 {strides = array<i32>} : memref<1x8x128xf32, #tpu.memory_space<vmem>>, vector<1x1x128xf32>,
    } else {
    }
    %c2_i32 = arith.constant 2 : i32
    %36 = arith.cmpi eq, %arg1, %c2_i32 : i32
    %37 = arith.extui %36 : i1 to i32
    %c0_i32_27 = arith.constant 0 : i32
    %38 = arith.cmpi ne, %37, %c0_i32_27 : i32
    scf.if %38 {
      %51 = vector.shape_cast %18 : vector<1x128xf32> to vector<1x1x128xf32>
      %c0_33 = arith.constant 0 : index
      %c2 = arith.constant 2 : index
      %c0_34 = arith.constant 0 : index
      %52 = vector.load %arg7[%c0_33, %c2, %c0_34] : memref<1x8x128xf32, #tpu.memory_space<vmem>>, vector<1x1x128xf32>
      tpu.vector_store %arg7[%c0_33, %c2, %c0_34], %51 {strides = array<i32>} : memref<1x8x128xf32, #tpu.memory_space<vmem>>, vector<1x1x128xf32>,
    } else {
    }
    %c3_i32 = arith.constant 3 : i32
    %39 = arith.cmpi eq, %arg1, %c3_i32 : i32
    %40 = arith.extui %39 : i1 to i32
    %c0_i32_28 = arith.constant 0 : i32
    %41 = arith.cmpi ne, %40, %c0_i32_28 : i32
    scf.if %41 {
      %51 = vector.shape_cast %18 : vector<1x128xf32> to vector<1x1x128xf32>
      %c0_33 = arith.constant 0 : index
      %c3 = arith.constant 3 : index
      %c0_34 = arith.constant 0 : index
      %52 = vector.load %arg7[%c0_33, %c3, %c0_34] : memref<1x8x128xf32, #tpu.memory_space<vmem>>, vector<1x1x128xf32>
      tpu.vector_store %arg7[%c0_33, %c3, %c0_34], %51 {strides = array<i32>} : memref<1x8x128xf32, #tpu.memory_space<vmem>>, vector<1x1x128xf32>,
    } else {
    }
    %c4_i32 = arith.constant 4 : i32
    %42 = arith.cmpi eq, %arg1, %c4_i32 : i32
    %43 = arith.extui %42 : i1 to i32
    %c0_i32_29 = arith.constant 0 : i32
    %44 = arith.cmpi ne, %43, %c0_i32_29 : i32
    scf.if %44 {
      %51 = vector.shape_cast %18 : vector<1x128xf32> to vector<1x1x128xf32>
      %c0_33 = arith.constant 0 : index
      %c4 = arith.constant 4 : index
      %c0_34 = arith.constant 0 : index
      %52 = vector.load %arg7[%c0_33, %c4, %c0_34] : memref<1x8x128xf32, #tpu.memory_space<vmem>>, vector<1x1x128xf32>
      tpu.vector_store %arg7[%c0_33, %c4, %c0_34], %51 {strides = array<i32>} : memref<1x8x128xf32, #tpu.memory_space<vmem>>, vector<1x1x128xf32>,
    } else {
    }
    %c5_i32 = arith.constant 5 : i32
    %45 = arith.cmpi eq, %arg1, %c5_i32 : i32
    %46 = arith.extui %45 : i1 to i32
    %c0_i32_30 = arith.constant 0 : i32
    %47 = arith.cmpi ne, %46, %c0_i32_30 : i32
    scf.if %47 {
      %51 = vector.shape_cast %18 : vector<1x128xf32> to vector<1x1x128xf32>
      %c0_33 = arith.constant 0 : index
      %c5 = arith.constant 5 : index
      %c0_34 = arith.constant 0 : index
      %52 = vector.load %arg7[%c0_33, %c5, %c0_34] : memref<1x8x128xf32, #tpu.memory_space<vmem>>, vector<1x1x128xf32>
      tpu.vector_store %arg7[%c0_33, %c5, %c0_34], %51 {strides = array<i32>} : memref<1x8x128xf32, #tpu.memory_space<vmem>>, vector<1x1x128xf32>,
    } else {
    }
    %c5_i32_31 = arith.constant 5 : i32
    %48 = arith.cmpi eq, %arg1, %c5_i32_31 : i32
    %49 = arith.extui %48 : i1 to i32
    %c0_i32_32 = arith.constant 0 : i32
    %50 = arith.cmpi ne, %49, %c0_i32_32 : i32
    scf.if %50 {
      %c0_33 = arith.constant 0 : index
      %c0_34 = arith.constant 0 : index
      %51 = vector.load %arg9[%c0_33, %c0_34] : memref<1x128xf32, #tpu.memory_space<vmem>>, vector<1x128xf32>
      %52 = vector.shape_cast %51 : vector<1x128xf32> to vector<1x1x128xf32>
      %c0_35 = arith.constant 0 : index
      %c6 = arith.constant 6 : index
      %c0_36 = arith.constant 0 : index
      %53 = vector.load %arg7[%c0_35, %c6, %c0_36] : memref<1x8x128xf32, #tpu.memory_space<vmem>>, vector<1x1x128xf32>
      tpu.vector_store %arg7[%c0_35, %c6, %c0_36], %52 {strides = array<i32>} : memref<1x8x128xf32, #tpu.memory_space<vmem>>, vector<1x1x128xf32>,
      %c0_37 = arith.constant 0 : index
      %c0_38 = arith.constant 0 : index
      %54 = vector.load %arg8[%c0_37, %c0_38] : memref<1x64xf32, #tpu.memory_space<vmem>>, vector<1x64xf32>
      %cst_39 = arith.constant 0.000000e+00 : f32
      %55 = vector.broadcast %cst_39 : f32 to vector<1x64xf32>
      %56 = tpu.concatenate %54, %55 in 1 : vector<1x64xf32>, vector<1x64xf32> -> vector<1x128xf32>
      %57 = vector.shape_cast %56 : vector<1x128xf32> to vector<1x1x128xf32>
      %c0_40 = arith.constant 0 : index
      %c7 = arith.constant 7 : index
      %c0_41 = arith.constant 0 : index
      %58 = vector.load %arg7[%c0_40, %c7, %c0_41] : memref<1x8x128xf32, #tpu.memory_space<vmem>>, vector<1x1x128xf32>
      tpu.vector_store %arg7[%c0_40, %c7, %c0_41], %57 {strides = array<i32>} : memref<1x8x128xf32, #tpu.memory_space<vmem>>, vector<1x1x128xf32>,
    } else {
    }
    return
  }
  func.func @transform_0(%arg0: i32, %arg1: i32) -> (i32, i32, i32) {
    %c0_i32 = arith.constant 0 : i32
    %c0_i32_0 = arith.constant 0 : i32
    return %arg0, %arg1, %c0_i32 : i32, i32, i32
  }
  func.func @transform_1(%arg0: i32, %arg1: i32) -> (i32, i32) {
    %c0_i32 = arith.constant 0 : i32
    %c0_i32_0 = arith.constant 0 : i32
    %c0_i32_1 = arith.constant 0 : i32
    return %c0_i32, %c0_i32_0 : i32, i32
  }
  func.func @transform_2(%arg0: i32, %arg1: i32) -> (i32, i32) {
    %c0_i32 = arith.constant 0 : i32
    %c0_i32_0 = arith.constant 0 : i32
    %c0_i32_1 = arith.constant 0 : i32
    return %c0_i32, %c0_i32_0 : i32, i32
  }
  func.func @transform_3(%arg0: i32, %arg1: i32) -> (i32, i32) {
    %c0_i32 = arith.constant 0 : i32
    %c0_i32_0 = arith.constant 0 : i32
    %c0_i32_1 = arith.constant 0 : i32
    return %c0_i32, %c0_i32_0 : i32, i32
  }
  func.func @transform_4(%arg0: i32, %arg1: i32) -> (i32, i32) {
    %c0_i32 = arith.constant 0 : i32
    %c0_i32_0 = arith.constant 0 : i32
    %c0_i32_1 = arith.constant 0 : i32
    return %c0_i32, %c0_i32_0 : i32, i32
  }
  func.func @transform_5(%arg0: i32, %arg1: i32) -> (i32, i32, i32) {
    %c0_i32 = arith.constant 0 : i32
    %c0_i32_0 = arith.constant 0 : i32
    %c0_i32_1 = arith.constant 0 : i32
    return %arg0, %c0_i32, %c0_i32_0 : i32, i32, i32
  }
}

module attributes {stable_mosaic.version = 11 : i64} {
  func.func @_txt_fused_kernel(%arg0: i32, %arg1: memref<1x8x32xbf16, #tpu.memory_space<vmem>>, %arg2: memref<32x64xbf16, #tpu.memory_space<vmem>>, %arg3: memref<1x64xf32, #tpu.memory_space<vmem>>, %arg4: memref<32x768xbf16, #tpu.memory_space<vmem>>, %arg5: memref<1x768xf32, #tpu.memory_space<vmem>>, %arg6: memref<1x8x128xf32, #tpu.memory_space<vmem>>) attributes {dimension_semantics = [#tpu.dimension_semantics<parallel>], iteration_bounds = array<i64: 2>, scalar_prefetch = 0 : i64, scratch_operands = 0 : i64, tpu.core_type = #tpu.core_type<tc>, window_params = [{transform_indices = @transform_0, window_bounds = array<i64: 1, 8, 32>}, {pipeline_mode = #tpu.pipeline_mode<synchronous>, transform_indices = @transform_1, window_bounds = array<i64: 32, 64>}, {pipeline_mode = #tpu.pipeline_mode<synchronous>, transform_indices = @transform_2, window_bounds = array<i64: 1, 64>}, {pipeline_mode = #tpu.pipeline_mode<synchronous>, transform_indices = @transform_3, window_bounds = array<i64: 32, 768>}, {pipeline_mode = #tpu.pipeline_mode<synchronous>, transform_indices = @transform_4, window_bounds = array<i64: 1, 768>}, {transform_indices = @transform_5, window_bounds = array<i64: 1, 8, 128>}]} {
    %c0 = arith.constant 0 : index
    %c0_0 = arith.constant 0 : index
    %c0_1 = arith.constant 0 : index
    %0 = vector.load %arg1[%c0, %c0_0, %c0_1] : memref<1x8x32xbf16, #tpu.memory_space<vmem>>, vector<1x8x32xbf16>
    %1 = vector.shape_cast %0 : vector<1x8x32xbf16> to vector<8x32xbf16>
    %c0_2 = arith.constant 0 : index
    %c0_3 = arith.constant 0 : index
    %2 = vector.load %arg2[%c0_2, %c0_3] : memref<32x64xbf16, #tpu.memory_space<vmem>>, vector<32x64xbf16>
    %cst = arith.constant dense<0.000000e+00> : vector<8x64xf32>
    %3 = tpu.matmul %1, %2, %cst {dimension_numbers = #tpu.dot_dimension_numbers<[1], [0], [0], [1], [0, 0, 1, 1], [], []>} : vector<8x32xbf16>, vector<32x64xbf16>, vector<8x64xf32> -> vector<8x64xf32>
    %c0_4 = arith.constant 0 : index
    %c0_5 = arith.constant 0 : index
    %4 = vector.load %arg3[%c0_4, %c0_5] : memref<1x64xf32, #tpu.memory_space<vmem>>, vector<1x64xf32>
    %5 = vector.broadcast %4 : vector<1x64xf32> to vector<8x64xf32>
    %6 = arith.addf %3, %5 : vector<8x64xf32>
    %cst_6 = arith.constant 0.000000e+00 : f32
    %7 = vector.broadcast %cst_6 : f32 to vector<8x64xf32>
    %8 = arith.maximumf %6, %7 : vector<8x64xf32>
    %cst_7 = arith.constant dense<0xFF800000> : vector<64xf32>
    %9 = vector.multi_reduction <maximumf>, %8, %cst_7 [0] : vector<8x64xf32> to vector<64xf32>
    %10 = vector.shape_cast %9 : vector<64xf32> to vector<1x64xf32>
    %c0_8 = arith.constant 0 : index
    %c0_9 = arith.constant 0 : index
    %11 = vector.load %arg4[%c0_8, %c0_9] : memref<32x768xbf16, #tpu.memory_space<vmem>>, vector<32x768xbf16>
    %cst_10 = arith.constant dense<0.000000e+00> : vector<8x768xf32>
    %12 = tpu.matmul %1, %11, %cst_10 {dimension_numbers = #tpu.dot_dimension_numbers<[1], [0], [0], [1], [0, 0, 1, 1], [], []>} : vector<8x32xbf16>, vector<32x768xbf16>, vector<8x768xf32> -> vector<8x768xf32>
    %c0_11 = arith.constant 0 : index
    %c0_12 = arith.constant 0 : index
    %13 = vector.load %arg5[%c0_11, %c0_12] : memref<1x768xf32, #tpu.memory_space<vmem>>, vector<1x768xf32>
    %14 = vector.broadcast %13 : vector<1x768xf32> to vector<8x768xf32>
    %15 = arith.addf %12, %14 : vector<8x768xf32>
    %cst_13 = arith.constant 0.000000e+00 : f32
    %16 = vector.broadcast %cst_13 : f32 to vector<8x768xf32>
    %17 = arith.maximumf %15, %16 : vector<8x768xf32>
    %18 = vector.extract_strided_slice %17 {offsets = [0, 0], sizes = [8, 128], strides = [1, 1]} : vector<8x768xf32> to vector<8x128xf32>
    %cst_14 = arith.constant dense<0xFF800000> : vector<128xf32>
    %19 = vector.multi_reduction <maximumf>, %18, %cst_14 [0] : vector<8x128xf32> to vector<128xf32>
    %20 = vector.shape_cast %19 : vector<128xf32> to vector<1x128xf32>
    %21 = vector.shape_cast %20 : vector<1x128xf32> to vector<1x1x128xf32>
    %c0_15 = arith.constant 0 : index
    %c0_16 = arith.constant 0 : index
    %c0_17 = arith.constant 0 : index
    %22 = vector.load %arg6[%c0_15, %c0_16, %c0_17] : memref<1x8x128xf32, #tpu.memory_space<vmem>>, vector<1x1x128xf32>
    tpu.vector_store %arg6[%c0_15, %c0_16, %c0_17], %21 {strides = array<i32>} : memref<1x8x128xf32, #tpu.memory_space<vmem>>, vector<1x1x128xf32>,
    %23 = vector.extract_strided_slice %17 {offsets = [0, 128], sizes = [8, 128], strides = [1, 1]} : vector<8x768xf32> to vector<8x128xf32>
    %cst_18 = arith.constant dense<0xFF800000> : vector<128xf32>
    %24 = vector.multi_reduction <maximumf>, %23, %cst_18 [0] : vector<8x128xf32> to vector<128xf32>
    %25 = vector.shape_cast %24 : vector<128xf32> to vector<1x128xf32>
    %26 = vector.shape_cast %25 : vector<1x128xf32> to vector<1x1x128xf32>
    %c0_19 = arith.constant 0 : index
    %c1 = arith.constant 1 : index
    %c0_20 = arith.constant 0 : index
    %27 = vector.load %arg6[%c0_19, %c1, %c0_20] : memref<1x8x128xf32, #tpu.memory_space<vmem>>, vector<1x1x128xf32>
    tpu.vector_store %arg6[%c0_19, %c1, %c0_20], %26 {strides = array<i32>} : memref<1x8x128xf32, #tpu.memory_space<vmem>>, vector<1x1x128xf32>,
    %28 = arith.maximumf %20, %25 : vector<1x128xf32>
    %29 = vector.extract_strided_slice %17 {offsets = [0, 256], sizes = [8, 128], strides = [1, 1]} : vector<8x768xf32> to vector<8x128xf32>
    %cst_21 = arith.constant dense<0xFF800000> : vector<128xf32>
    %30 = vector.multi_reduction <maximumf>, %29, %cst_21 [0] : vector<8x128xf32> to vector<128xf32>
    %31 = vector.shape_cast %30 : vector<128xf32> to vector<1x128xf32>
    %32 = vector.shape_cast %31 : vector<1x128xf32> to vector<1x1x128xf32>
    %c0_22 = arith.constant 0 : index
    %c2 = arith.constant 2 : index
    %c0_23 = arith.constant 0 : index
    %33 = vector.load %arg6[%c0_22, %c2, %c0_23] : memref<1x8x128xf32, #tpu.memory_space<vmem>>, vector<1x1x128xf32>
    tpu.vector_store %arg6[%c0_22, %c2, %c0_23], %32 {strides = array<i32>} : memref<1x8x128xf32, #tpu.memory_space<vmem>>, vector<1x1x128xf32>,
    %34 = arith.maximumf %28, %31 : vector<1x128xf32>
    %35 = vector.extract_strided_slice %17 {offsets = [0, 384], sizes = [8, 128], strides = [1, 1]} : vector<8x768xf32> to vector<8x128xf32>
    %cst_24 = arith.constant dense<0xFF800000> : vector<128xf32>
    %36 = vector.multi_reduction <maximumf>, %35, %cst_24 [0] : vector<8x128xf32> to vector<128xf32>
    %37 = vector.shape_cast %36 : vector<128xf32> to vector<1x128xf32>
    %38 = vector.shape_cast %37 : vector<1x128xf32> to vector<1x1x128xf32>
    %c0_25 = arith.constant 0 : index
    %c3 = arith.constant 3 : index
    %c0_26 = arith.constant 0 : index
    %39 = vector.load %arg6[%c0_25, %c3, %c0_26] : memref<1x8x128xf32, #tpu.memory_space<vmem>>, vector<1x1x128xf32>
    tpu.vector_store %arg6[%c0_25, %c3, %c0_26], %38 {strides = array<i32>} : memref<1x8x128xf32, #tpu.memory_space<vmem>>, vector<1x1x128xf32>,
    %40 = arith.maximumf %34, %37 : vector<1x128xf32>
    %41 = vector.extract_strided_slice %17 {offsets = [0, 512], sizes = [8, 128], strides = [1, 1]} : vector<8x768xf32> to vector<8x128xf32>
    %cst_27 = arith.constant dense<0xFF800000> : vector<128xf32>
    %42 = vector.multi_reduction <maximumf>, %41, %cst_27 [0] : vector<8x128xf32> to vector<128xf32>
    %43 = vector.shape_cast %42 : vector<128xf32> to vector<1x128xf32>
    %44 = vector.shape_cast %43 : vector<1x128xf32> to vector<1x1x128xf32>
    %c0_28 = arith.constant 0 : index
    %c4 = arith.constant 4 : index
    %c0_29 = arith.constant 0 : index
    %45 = vector.load %arg6[%c0_28, %c4, %c0_29] : memref<1x8x128xf32, #tpu.memory_space<vmem>>, vector<1x1x128xf32>
    tpu.vector_store %arg6[%c0_28, %c4, %c0_29], %44 {strides = array<i32>} : memref<1x8x128xf32, #tpu.memory_space<vmem>>, vector<1x1x128xf32>,
    %46 = arith.maximumf %40, %43 : vector<1x128xf32>
    %47 = vector.extract_strided_slice %17 {offsets = [0, 640], sizes = [8, 128], strides = [1, 1]} : vector<8x768xf32> to vector<8x128xf32>
    %cst_30 = arith.constant dense<0xFF800000> : vector<128xf32>
    %48 = vector.multi_reduction <maximumf>, %47, %cst_30 [0] : vector<8x128xf32> to vector<128xf32>
    %49 = vector.shape_cast %48 : vector<128xf32> to vector<1x128xf32>
    %50 = vector.shape_cast %49 : vector<1x128xf32> to vector<1x1x128xf32>
    %c0_31 = arith.constant 0 : index
    %c5 = arith.constant 5 : index
    %c0_32 = arith.constant 0 : index
    %51 = vector.load %arg6[%c0_31, %c5, %c0_32] : memref<1x8x128xf32, #tpu.memory_space<vmem>>, vector<1x1x128xf32>
    tpu.vector_store %arg6[%c0_31, %c5, %c0_32], %50 {strides = array<i32>} : memref<1x8x128xf32, #tpu.memory_space<vmem>>, vector<1x1x128xf32>,
    %52 = arith.maximumf %46, %49 : vector<1x128xf32>
    %53 = vector.shape_cast %52 : vector<1x128xf32> to vector<1x1x128xf32>
    %c0_33 = arith.constant 0 : index
    %c6 = arith.constant 6 : index
    %c0_34 = arith.constant 0 : index
    %54 = vector.load %arg6[%c0_33, %c6, %c0_34] : memref<1x8x128xf32, #tpu.memory_space<vmem>>, vector<1x1x128xf32>
    tpu.vector_store %arg6[%c0_33, %c6, %c0_34], %53 {strides = array<i32>} : memref<1x8x128xf32, #tpu.memory_space<vmem>>, vector<1x1x128xf32>,
    %cst_35 = arith.constant 0.000000e+00 : f32
    %55 = vector.broadcast %cst_35 : f32 to vector<1x64xf32>
    %56 = tpu.concatenate %10, %55 in 1 : vector<1x64xf32>, vector<1x64xf32> -> vector<1x128xf32>
    %57 = vector.shape_cast %56 : vector<1x128xf32> to vector<1x1x128xf32>
    %c0_36 = arith.constant 0 : index
    %c7 = arith.constant 7 : index
    %c0_37 = arith.constant 0 : index
    %58 = vector.load %arg6[%c0_36, %c7, %c0_37] : memref<1x8x128xf32, #tpu.memory_space<vmem>>, vector<1x1x128xf32>
    tpu.vector_store %arg6[%c0_36, %c7, %c0_37], %57 {strides = array<i32>} : memref<1x8x128xf32, #tpu.memory_space<vmem>>, vector<1x1x128xf32>,
    return
  }
  func.func @transform_0(%arg0: i32) -> (i32, i32, i32) {
    %c0_i32 = arith.constant 0 : i32
    %c0_i32_0 = arith.constant 0 : i32
    %c0_i32_1 = arith.constant 0 : i32
    return %arg0, %c0_i32, %c0_i32_0 : i32, i32, i32
  }
  func.func @transform_1(%arg0: i32) -> (i32, i32) {
    %c0_i32 = arith.constant 0 : i32
    %c0_i32_0 = arith.constant 0 : i32
    %c0_i32_1 = arith.constant 0 : i32
    return %c0_i32, %c0_i32_0 : i32, i32
  }
  func.func @transform_2(%arg0: i32) -> (i32, i32) {
    %c0_i32 = arith.constant 0 : i32
    %c0_i32_0 = arith.constant 0 : i32
    %c0_i32_1 = arith.constant 0 : i32
    return %c0_i32, %c0_i32_0 : i32, i32
  }
  func.func @transform_3(%arg0: i32) -> (i32, i32) {
    %c0_i32 = arith.constant 0 : i32
    %c0_i32_0 = arith.constant 0 : i32
    %c0_i32_1 = arith.constant 0 : i32
    return %c0_i32, %c0_i32_0 : i32, i32
  }
  func.func @transform_4(%arg0: i32) -> (i32, i32) {
    %c0_i32 = arith.constant 0 : i32
    %c0_i32_0 = arith.constant 0 : i32
    %c0_i32_1 = arith.constant 0 : i32
    return %c0_i32, %c0_i32_0 : i32, i32
  }
  func.func @transform_5(%arg0: i32) -> (i32, i32, i32) {
    %c0_i32 = arith.constant 0 : i32
    %c0_i32_0 = arith.constant 0 : i32
    %c0_i32_1 = arith.constant 0 : i32
    return %arg0, %c0_i32, %c0_i32_0 : i32, i32, i32
  }
}

</mosaic_0001>

<bundles_post_ra>
// kernel: network_forward_packed.2
= control target key start
LH: loop header
LB: loop body
LE: loop exit
PB: predicated region body
PF: predicated region fallthrough
CT: control target
= control target key end

     0   :  { %10 = vsyncpa [#allocation5], 0  ;;  %s1084_s0 = inlined_call_operand.vmem [shape: bf16[2,192,48], index: 0, kind: input, shape index: {}]   ;;  %s1085_s1 = inlined_call_operand.vmem [shape: bf16[48,64], index: 1, kind: input, shape index: {}]   ;;  %s1086_s2 = inlined_call_operand.vmem [shape: f32[1,64], index: 2, kind: input, shape index: {}]   ;;  %s1087_s3 = inlined_call_operand.vmem [shape: bf16[64,128], index: 3, kind: input, shape index: {}]   ;;  %s1088_s4 = inlined_call_operand.vmem [shape: f32[1,128], index: 4, kind: input, shape index: {}]   ;;  %s1089_s5 = inlined_call_operand.hbm [shape: f32[2,8,128], index: 5, kind: output, shape index: {}]  }
   0x1   :  { %12 = vsyncpa [#allocation5 + $0x1], 0  ;;  %s895_s18 = smov 0   ;;  %s897_s19 = smov 0  }
   0x2   :  { %s899_s20 = smov 0   ;;  %s901_s21 = smov 0  }
   0x3   :  { %s903_s22 = smov 0   ;;  %s905_s23 = smov 0  }
   0x4   :  { %s907_s24 = smov 0   ;;  %s909_s25 = smov 0  }
   0x5 LB: > { %s618_s26 = sadd.s32 4294967295, %s861_s25   ;;  %s619_s27 = sadd.s32 4294967294, %s861_s25   ;;  %s861_s25 = sphi %s909_s25, %s18_s25   ;;  %s857_s24 = sphi %s907_s24, %s1098_s24   ;;  %s853_s23 = sphi %s905_s23, %s1097_s23   ;;  %s849_s22 = sphi %s903_s22, %s1096_s22   ;;  %s845_s21 = sphi %s901_s21, %s1095_s21   ;;  %s841_s20 = sphi %s899_s20, %s1094_s20   ;;  %s837_s19 = sphi %s897_s19, %s1093_s19   ;;  %s833_s18 = sphi %s895_s18, %s1092_s18  }
   0x6   : > { %s27_s28 = sadd.s32 1, %s853_s23  ;;  %s30_s29 = sadd.s32 1, %s857_s24 }
   0x7   : > { %p28_p0 = scmp.ge.s32.totalorder %s27_s28, 6  ;;  %p159_p1 = scmp.ne.s32.totalorder %s841_s20, %s837_s19 }
   0x8   : > { %p160_p2 = scmp.eq.s32.totalorder %s618_s26, 11  ;;  %p165_p4 = scmp.ne.s32.totalorder %s837_s19, %s833_s18 }
   0x9   : > { %s1100_s28 = smov (%p28_p0, %s27_s28), 0  ;;  %s1102_s29 = smov (!%p28_p0, %s30_s29), %s857_s24 }
   0xa   : > { %p944_p3 = por %p160_p2, %p159_p1  ;;  %p32_p5 = scmp.ge.s32.totalorder %s1102_s29, 2 }
   0xb   : > { %p166_p6 = scmp.eq.s32.totalorder %s619_s27, 11  ;;  %p622_p7 = scmp.ge.s32.totalorder %s861_s25, 1 }
   0xc   : > { %p209_p8 = scmp.lt.s32.totalorder %s861_s25, 13  ;;  %s1104_s29 = smov (%p32_p5, %s1102_s29), 0 }
   0xd   : > { %p954_p9 = por %p166_p6, %p165_p4  ;;  %s146_s7 = ssub.s32 %s857_s24, %s1104_s29 }
   0xe   : > { %p210_p10 = pnand %p622_p7, %p209_p8  ;;  %s149_s8 = sadd.s32 1, %s841_s20 }
   0xf   : > { %p147_p11 = scmp.eq.s32.totalorder %s146_s7, 0  ;;  %s238_s10 = sand.u32 (!%p210_p10), 1, %s837_s19   ;;  %v758_v0 = vld [vmem:[%s1085_s1] sm:$0xff] (!%p210_p10)   ;;  %v759_v1 = vld [vmem:[%s1085_s1 + $0x8] sm:$0xff] (!%p210_p10)   ;;  %v760_v2 = vld [vmem:[%s1085_s1 + $0x10] sm:$0xff] (!%p210_p10)   ;;  %vm297_vm0 = vcmask (!%p210_p10), 392192  }
  0x10   : > { %213 = sbr.rel (%p210_p10) target bundleno = 564 (0x234), region = 40  ;;  %s970_s13 = sshll.u32 (!%p210_p10), %s238_s10, 3  ;;  %663 = vmatprep.subr.bf16.mxu0 (!%p210_p10), %v758_v0  ;;  %v763_v3 = vld [vmem:[%s1087_s3] sm:$0xff] (!%p210_p10)   ;;  %v764_v4 = vld [vmem:[%s1087_s3 + $0x8] sm:$0xff] (!%p210_p10)   ;;  %v765_v7 = vld [vmem:[%s1087_s3 + $0x10] sm:$0xff] (!%p210_p10)   ;;  %vm398_vm1 = vcmask (!%p210_p10), 523264  }
  0x11   : > { %s962_s9 = scalar_select %p147_p11, %s841_s20, %s149_s8  }
  0x12   : > { %664 = vmatpush3.bf16.msra.mxu0 (!%p210_p10), %v758_v0  ;;  %s624_s26 = sshll.u32 (!%p210_p10), %s845_s21, 2  ;;  %p242_p12 = scmp.lt.s32.totalorder (!%p210_p10), %s849_s22, 1  ;;  %673 = vmatprep.subr.bf16.mxu1 (!%p210_p10), %v763_v3  ;;  %v766_v8 = vld [vmem:[%s1087_s3 + $0x18] sm:$0xff] (!%p210_p10)   ;;  %v626_v9 = vld [vmem:[%s1086_s2] ss:$0 sm:$0xff] (!%p210_p10) }
  0x13   : > { %665 = vmatprep.subr.bf16.mxu0 (!%p210_p10), %v759_v1  ;;  %p244_p13 = scmp.lt.s32.totalorder (!%p210_p10), %s624_s26, 23  ;;  %674 = vmatpush3.bf16.msra.mxu1 (!%p210_p10), %v763_v3  ;;  %v634_v37 = vld [vmem:[%s1088_s4] ss:$0 sm:$0xff] (!%p210_p10)  ;;  %s1009_s27 = scalar_lea.vmem (!%p210_p10), [#allocation4], %s970_s13 }
  0x14   : > { %675 = vmatprep.subr.bf16.mxu1 (!%p210_p10), %v764_v4  ;;  %p641_p0 = scmp.ne.s32.totalorder (!%p210_p10), %s845_s21, 0 }
  0x16   : > { %666 = vmatpush3.bf16.msra.mxu0 (!%p210_p10), %v759_v1 }
  0x17   : > { %s243_s12 = scalar_select %p242_p12, %s849_s22, 1  ;;  %667 = vmatprep.subr.bf16.mxu0 %v760_v2  ;;  %676 = vmatpush3.bf16.msra.mxu1 %v764_v4 }
  0x18   : > { %s1106_s26 = smov (!%p244_p13, %s624_s26), 23  ;;  %677 = vmatprep.subr.bf16.mxu1 %v765_v7  ;;  %vm484_vm2 = vcmask (!%p641_p0), 516096   ;;  %v863_v59 = vmov (!%p641_p0), -inf  }
  0x19   : > { %s685_s14 = smul.u32 24, %s243_s12  ;;  %485 = vst.msk [vmem:[#allocation2] sm:$0x1] (!%p641_p0), %vm484_vm2, %v863_v59  ;;  %486 = vst [vmem:[#allocation3] sm:$0x1] (!%p641_p0), %v863_v59 }
  0x1a   : > { %668 = vmatpush3.bf16.msra.mxu0 %v760_v2 }
  0x1b   : > { %s247_s15 = sadd.s32 %s685_s14, %s1106_s26  ;;  %678 = vmatpush3.bf16.msra.mxu1 %v765_v7 }
  0x1c   : > { %s625_s16 = sshll.u32 %s247_s15, 2  ;;  %679 = vmatprep.subr.bf16.mxu1 %v766_v8 }
  0x1d   : > { %s249_s7 = scalar_lea.vmem %s1084_s0, %s625_s16 }
  0x1e   : > { %v761_v5 = vld [vmem:[%s249_s7] sm:$0xff]   ;;  %v762_v6 = vld [vmem:[%s249_s7 + $0x8] sm:$0xff]  }
  0x1f   : > { %669 = vmatprep.mubr.msk.bf16.mxu0 %vm297_vm0, %v761_v5  ;;  %680 = vmatpush3.bf16.msra.mxu1 %v766_v8 }
  0x20   : > { %670 = vmatmul.mubr.msk.bf16.vlgmr.msra.gmra.mrb[0].mxu0 %vm297_vm0, %v762_v6 }
  0xf3   : > { %v671_v10 = vpop.f32.mrb[0].mxu0 }
  0xf4   : > { %v347_v11 = vadd.f32 %v671_v10, %v626_v9  ;;  %v338_v12 = vpop.f32.mrb[1].mxu0 }
  0xf5   : > { %v339_v13 = vadd.f32 %v626_v9, %v338_v12  ;;  %v672_v14 = vpop.f32.mrb[2].mxu0 }
  0xf6   : > { %v355_v15 = vmax.f32 %v347_v11, 0.0  ;;  %v350_v16 = vadd.f32 %v672_v14, %v626_v9  ;;  %v341_v17 = vpop.f32.mrb[3].mxu0 }
  0xf7   : > { %v353_v18 = vmax.f32 %v339_v13, 0.0  ;;  %v342_v19 = vadd.f32 %v626_v9, %v341_v17 }
  0xf8   : > { %v469_v20 = vsel %vm398_vm1, %v355_v15, -inf  ;;  %v356_v21 = vmax.f32 %v350_v16, 0.0 }
  0xf9   : > { %v467_v22 = vsel %vm398_vm1, %v353_v18, -inf  ;;  %v354_v23 = vmax.f32 %v342_v19, 0.0 }
  0xfa   : > { %v358_v24 = vpack.c.bf16 %v356_v21, %v355_v15  ;;  %v470_v25 = vsel %vm398_vm1, %v356_v21, -inf }
  0xfb   : > { %v472_v26 = vmax.f32 %v469_v20, %v470_v25  ;;  %v468_v27 = vsel %vm398_vm1, %v354_v23, -inf  ;;  %v357_v28 = vpack.c.bf16 %v354_v23, %v353_v18 }
  0xfc   : > { %v471_v29 = vmax.f32 %v467_v22, %v468_v27 }
  0xfd   : > { %681 = vmatprep.mubr.msk.bf16.mxu1 %vm398_vm1, %v357_v28 }
  0xfe   : > { %v473_v30 = vmax.f32 %v471_v29, %v472_v26  ;;  %682 = vmatmul.mubr.msk.bf16.vlgmr.msra.gmra.mrb[0].mxu1 %vm398_vm1, %v358_v24 }
 0x100   : > { %v474_v31 = vrot.slane %v473_v30, 4 }
 0x102   : > { %v475_v32 = vmax.f32 %v473_v30, %v474_v31 }
 0x104   : > { %v476_v33 = vrot.slane %v475_v32, 2 }
 0x106   : > { %v477_v34 = vmax.f32 %v475_v32, %v476_v33 }
 0x108   : > { %v478_v35 = vrot.slane %v477_v34, 1 }
 0x10a   : > { %v479_v36 = vmax.f32 %v477_v34, %v478_v35 }
 0x1d1   : > { %v683_v38 = vpop.f32.mrb[0].mxu1 }
 0x1d2   : > { %v448_v39 = vadd.f32 %v683_v38, %v634_v37  ;;  %v439_v40 = vpop.f32.mrb[1].mxu1 }
 0x1d3   : > { %v440_v41 = vadd.f32 %v634_v37, %v439_v40  ;;  %v684_v42 = vpop.f32.mrb[2].mxu1 }
 0x1d4   : > { %v451_v43 = vadd.f32 %v684_v42, %v634_v37  ;;  %v442_v44 = vpop.f32.mrb[3].mxu1  ;;  %v456_v46 = vmax.f32 %v448_v39, 0.0 }
 0x1d5   : > { %v443_v45 = vadd.f32 %v634_v37, %v442_v44  ;;  %v454_v48 = vmax.f32 %v440_v41, 0.0 }
 0x1d6   : > { %v457_v47 = vmax.f32 %v451_v43, 0.0 }
 0x1d7   : > { %v455_v49 = vmax.f32 %v443_v45, 0.0 }
 0x1d8   : > { %v459_v50 = vmax.f32 %v456_v46, %v457_v47 }
 0x1d9   : > { %v458_v51 = vmax.f32 %v454_v48, %v455_v49 }
 0x1db   : > { %v460_v52 = vmax.f32 %v458_v51, %v459_v50 }
 0x1dd   : > { %v461_v53 = vrot.slane %v460_v52, 4 }
 0x1df   : > { %v462_v54 = vmax.f32 %v460_v52, %v461_v53 }
 0x1e1   : > { %v463_v55 = vrot.slane %v462_v54, 2  ;;  %483 = sbr.rel (%p641_p0) target bundleno = 488 (0x1e8), region = 44 }
 0x1e3   : > { %v464_v56 = vmax.f32 %v462_v54, %v463_v55 }
 0x1e5   : > { %v465_v57 = vrot.slane %v464_v56, 1 }
 0x1e7   : > { %v466_v58 = vmax.f32 %v464_v56, %v465_v57 }
 0x1e8 PF: > { %v487_v60 = vld [vmem:[#allocation2] sm:$0x1]  ;;  %vm489_vm3 = vcmask 516096   ;;  %v491_v61 = vld [vmem:[#allocation3] sm:$0x1]  ;;  %496 = sbr.rel (%p641_p0) target bundleno = 495 (0x1ef), region = 48 }
 0x1e9   : > { %v488_v62 = vmax.f32 %v487_v60, %v479_v36  ;;  %v492_v63 = vmax.f32 %v491_v61, %v466_v58  ;;  %497 = vst [vmem:[%s1009_s27] sm:$0x1] (!%p641_p0), %v466_v58 }
 0x1eb   : > { %490 = vst.msk [vmem:[#allocation2] sm:$0x1] %vm489_vm3, %v488_v62  ;;  %493 = vst [vmem:[#allocation3] sm:$0x1] %v492_v63 }
 0x1ef PF: > { %p643_p1 = scmp.ne.s32.totalorder %s845_s21, 1 }
 0x1f0   : > { %502 = vst [vmem:[%s1009_s27 + $0x1] sm:$0x1] (!%p643_p1), %v466_v58 }
 0x1f1   : > { %501 = sbr.rel (%p643_p1) target bundleno = 504 (0x1f8), region = 52 }
 0x1f8 PF: > { %p644_p2 = scmp.ne.s32.totalorder %s845_s21, 2 }
 0x1f9   : > { %507 = vst [vmem:[%s1009_s27 + $0x2] sm:$0x1] (!%p644_p2), %v466_v58 }
 0x1fa   : > { %506 = sbr.rel (%p644_p2) target bundleno = 513 (0x201), region = 56 }
 0x201 PF: > { %p645_p4 = scmp.ne.s32.totalorder %s845_s21, 3 }
 0x202   : > { %512 = vst [vmem:[%s1009_s27 + $0x3] sm:$0x1] (!%p645_p4), %v466_v58 }
 0x203   : > { %511 = sbr.rel (%p645_p4) target bundleno = 522 (0x20a), region = 60 }
 0x20a PF: > { %p646_p5 = scmp.ne.s32.totalorder %s845_s21, 4 }
 0x20b   : > { %517 = vst [vmem:[%s1009_s27 + $0x4] sm:$0x1] (!%p646_p5), %v466_v58 }
 0x20c   : > { %516 = sbr.rel (%p646_p5) target bundleno = 531 (0x213), region = 64 }
 0x213 PF: > { %p647_p6 = scmp.ne.s32.totalorder %s845_s21, 5 }
 0x214   : > { %522 = vst [vmem:[%s1009_s27 + $0x5] sm:$0x1] (!%p647_p6), %v466_v58  ;;  %v523_v0 = vld [vmem:[#allocation3] sm:$0x1] (!%p647_p6)  ;;  %v525_v1 = vld [vmem:[#allocation2] sm:$0x1] (!%p647_p6) }
 0x215   : > { %521 = sbr.rel (%p647_p6) target bundleno = 540 (0x21c), region = 68  ;;  %524 = vst [vmem:[%s1009_s27 + $0x6] sm:$0x1] (!%p647_p6), %v523_v0  ;;  %v526_v2 = vsel (!%p647_p6), %vm398_vm1, %v525_v1, 0.0 }
 0x216   : > { %527 = vst [vmem:[%s1009_s27 + $0x7] sm:$0x1] (!%p647_p6), %v526_v2 }
 0x21c PF: > { %s649_s13 = sshll.u32 %s849_s22, 7  ;;  %s542_s11 = sshll.u32 %s1009_s27, 4  ;;  %s543_s11 = int_to_ptr.vmem [resolvable:$true] %s542_s11 }
 0x21d   : > { %s1034_s21 = scalar_lea.hbm %s1089_s5, %s649_s13  ;;  %s529_s12 = scalar_lea.sflag [#allocation5], %s238_s10 }
 0x21e   : > { %s767_s26 = scalar_lea.vmem %s543_s11, 128  ;;  %s864_s14 = smov [#allocation4]  }
 0x21f   : > { %p768_p7 = scmp.ne.s32.totalorder %s543_s11, %s767_s26  ;;  %s771_s15 = sshll.u32 %s864_s14, 4  ;;  %s772_s15 = int_to_ptr.vmem [resolvable:$false] %s771_s15 }
 0x220   : > { %s773_s16 = scalar_lea.vmem %s772_s15, 256  ;;  %p774_p11 = scmp.lt.s32.totalorder %s543_s11, %s772_s15 }
 0x221   : > { %p769_p8 = pnand %p768_p7, %p944_p3  ;;  %p775_p12 = scmp.lt.s32.totalorder %s773_s16, %s767_s26 }
 0x223   : > { %p770_p10 = pneg %p769_p8  ;;  %p776_p13 = por %p775_p12, %p774_p11 }
 0x225   : > { %p777_p0 = pnand %p776_p13, %p770_p10 }
 0x227   : > { %780 = shalt.err (!%p777_p0)
}
 0x228   : > { %s781_s22 = scalar_lea.hbm %s1034_s21, 128  ;;  %s785_s27 = scalar_lea.hbm %s1089_s5, 256 }
 0x229   : > { %p782_p1 = scmp.ne.s32.totalorder %s1034_s21, %s781_s22  ;;  %p786_p5 = scmp.lt.u32.totalorder %s1034_s21, %s1089_s5 }
 0x22a   : > { %p787_p6 = scmp.lt.u32.totalorder %s785_s27, %s781_s22  ;;  %p789_p8 = scmp.lt.u32.totalorder %s781_s22, %s1034_s21 }
 0x22b   : > { %p783_p2 = pnand %p782_p1, %p944_p3 }
 0x22c   : > { %p788_p7 = por %p787_p6, %p786_p5 }
 0x22d   : > { %p784_p4 = pneg %p783_p2 }
 0x22e   : > { %p790_p10 = por %p789_p8, %p788_p7 }
 0x230   : > { %p791_p11 = pnand %p790_p10, %p784_p4 }
 0x232   : > { %794 = shalt.err (!%p791_p11)
}
 0x233   : > { %686 = dma.vmem_to_hbm [thread:$0]  (%p944_p3), %s543_s11, 128, %s1034_s21, %s529_s12  }
 0x234 PF: > { %p692_p12 = scmp.ge.s32.totalorder %s861_s25, 2  ;;  %s554_s8 = sand.u32 1, %s833_s18  }
 0x235   : > { %s555_s26 = scalar_lea.sflag [#allocation5], %s554_s8 }
 0x236   : > { %p689_p13 = pnand %p692_p12, %p954_p9 }
 0x238   : > { %828 = dma.done.wait (!%p689_p13), %s555_s26, 128  }
 0x239   : > { %830 = vsyncadd (!%p689_p13), %s555_s26, 4294967168  ;;  %s18_s25 = sadd.s32 1, %s861_s25   ;;  %s1092_s18 = smov %s837_s19 }
 0x23a   : > { %p15_p0 = scmp.ge.s32.totalorder %s18_s25, 14   ;;  %s1093_s19 = smov %s841_s20 }
 0x23b   : > { %s1094_s20 = smov %s962_s9  ;;  %s1095_s21 = smov %s853_s23 }
 0x23c   : > { %s1096_s22 = smov %s857_s24  ;;  %s1097_s23 = smov %s1100_s28 }
 0x23d   : > { %s1098_s24 = smov %s1104_s29  ;;  %17 = sbr.rel (!%p15_p0) target bundleno = 5 (0x5), region = 103 }
 0x244   :  { %560 = vsyncpa [#allocation5], 1 }
 0x245   :  { %562 = vsyncpa [#allocation5 + $0x1], 1 }

// kernel: network_forward_packed.3
= control target key start
LH: loop header
LB: loop body
LE: loop exit
PB: predicated region body
PF: predicated region fallthrough
CT: control target
= control target key end

     0   :  { %10 = vsyncpa [#allocation3], 0  ;;  %s1023_s0 = inlined_call_operand.vmem [shape: bf16[2,8,32], index: 0, kind: input, shape index: {}]   ;;  %s1024_s1 = inlined_call_operand.vmem [shape: bf16[32,64], index: 1, kind: input, shape index: {}]   ;;  %s1025_s2 = inlined_call_operand.vmem [shape: f32[1,64], index: 2, kind: input, shape index: {}]   ;;  %s1026_s3 = inlined_call_operand.vmem [shape: bf16[32,768], index: 3, kind: input, shape index: {}]   ;;  %s1027_s4 = inlined_call_operand.vmem [shape: f32[1,768], index: 4, kind: input, shape index: {}]   ;;  %s1028_s5 = inlined_call_operand.hbm [shape: f32[2,8,128], index: 5, kind: output, shape index: {}]  }
   0x1   :  { %12 = vsyncpa [#allocation3 + $0x1], 0  ;;  %s854_s18 = smov 0   ;;  %s856_s19 = smov 0  }
   0x2   :  { %s858_s20 = smov 0   ;;  %s860_s21 = smov 0  }
   0x3 LB: > { %s875_s22 = sadd.s32 4294967295, %s818_s21   ;;  %s654_s23 = sadd.s32 4294967294, %s818_s21   ;;  %s818_s21 = sphi %s860_s21, %s1034_s21   ;;  %s814_s20 = sphi %s858_s20, %s1033_s20   ;;  %s810_s19 = sphi %s856_s19, %s1032_s19   ;;  %s806_s18 = sphi %s854_s18, %s1031_s18  }
   0x4   : > { %s879_s24 = sadd.s32 1, %s818_s21   ;;  %s135_s25 = sadd.s32 1, %s814_s20 }
   0x5   : > { %s132_s26 = ssub.s32 %s818_s21, %s879_s24  ;;  %p145_p0 = scmp.ne.s32.totalorder %s814_s20, %s810_s19 }
   0x6   : > { %p133_p1 = scmp.eq.s32.totalorder %s132_s26, 0  ;;  %p146_p2 = scmp.eq.s32.totalorder %s875_s22, 1 }
   0x7   : > { %p151_p3 = scmp.ne.s32.totalorder %s810_s19, %s806_s18  ;;  %p152_p4 = scmp.eq.s32.totalorder %s654_s23, 1 }
   0x8   : > { %s890_s27 = scalar_select %p133_p1, %s814_s20, %s135_s25  }
   0x9   : > { %p892_p5 = por %p146_p2, %p145_p0  ;;  %p896_p6 = por %p152_p4, %p151_p3 }
   0xa   : > { %p657_p7 = scmp.ge.s32.totalorder %s818_s21, 1  ;;  %p189_p8 = scmp.lt.s32.totalorder %s818_s21, 3 }
   0xc   : > { %p190_p9 = pnand %p657_p7, %p189_p8 }
   0xd   : > { %v736_v0 = vld [vmem:[%s1024_s1] sm:$0xff] (!%p190_p9)   ;;  %v820_v1 = vmov (!%p190_p9), 0.0   ;;  %p216_p10 = scmp.lt.s32.totalorder (!%p190_p9), %s875_s22, 1  ;;  %vm821_vm0 = vmmov (!%p190_p9), 0   ;;  %v740_v4 = vld [vmem:[%s1024_s1 + $0x8] sm:$0xff] (!%p190_p9)   ;;  %v822_v7 = vmov (!%p190_p9), 0   ;;  %v312_v17 = vlaneseq (!%p190_p9) }
   0xe   : > { %193 = sbr.rel (%p190_p9) target bundleno = 284 (0x11c), region = 40  ;;  %686 = vmatprep.subr.bf16.mxu0 (!%p190_p9), %v820_v1  ;;  %v737_v2 = vld [vmem:[%s1026_s3 + $0x4] ss:$24 sps:$4 sm:$0xff] (!%p190_p9)   ;;  %v739_v3 = vld [vmem:[%s1026_s3] ss:$24 sps:$4 sm:$0xff] (!%p190_p9)   ;;  %690 = vmatprep.mubr.msk.bf16.mxu0 (!%p190_p9), %vm821_vm0, %v820_v1  ;;  %vm245_vm1 = vcmask (!%p190_p9), 261120  }
   0xf   : > { %687 = vmatpush3.bf16.msra.mxu0 (!%p190_p9), %v736_v0  ;;  %402 = vmatprep.subr.bf16.mxu1 (!%p190_p9), %v737_v2  ;;  %v741_v5 = vld [vmem:[%s1026_s3 + $0x34] ss:$24 sps:$4 sm:$0xff] (!%p190_p9)   ;;  %v743_v6 = vld [vmem:[%s1026_s3 + $0x30] ss:$24 sps:$4 sm:$0xff] (!%p190_p9)   ;;  %v755_v15 = vld [vmem:[%s1026_s3 + $0x44] ss:$24 sps:$4 sm:$0xff] (!%p190_p9)  }
  0x10   : > { %688 = vmatprep.subr.bf16.mxu0 (!%p190_p9), %v820_v1  ;;  %403 = vmatpush1.bf16.msra.mxu1 (!%p190_p9), %v739_v3  ;;  %v746_v8 = vld [vmem:[%s1026_s3 + $0xc] ss:$24 sps:$4 sm:$0xff] (!%p190_p9)   ;;  %v744_v9 = vld [vmem:[%s1026_s3 + $0x8] ss:$24 sps:$4 sm:$0xff] (!%p190_p9)   ;;  %v752_v13 = vld [vmem:[%s1026_s3 + $0x3c] ss:$24 sps:$4 sm:$0xff] (!%p190_p9)  }
  0x11   : > { %434 = vmatprep.mubr.bf16.mxu1 (!%p190_p9), %v822_v7  ;;  %404 = vmatprep.subr.bf16.mxu1 (!%p190_p9), %v741_v5  ;;  %v749_v11 = vld [vmem:[%s1026_s3 + $0x14] ss:$24 sps:$4 sm:$0xff] (!%p190_p9)   ;;  %v747_v12 = vld [vmem:[%s1026_s3 + $0x10] ss:$24 sps:$4 sm:$0xff] (!%p190_p9)   ;;  %v753_v16 = vld [vmem:[%s1026_s3 + $0x40] ss:$24 sps:$4 sm:$0xff] (!%p190_p9)  }
  0x12   : > { %v750_v14 = vld [vmem:[%s1026_s3 + $0x38] ss:$24 sps:$4 sm:$0xff] (!%p190_p9)   ;;  %v313_v18 = vshrl.u32 (!%p190_p9), %v312_v17, 7  ;;  %v310_v20 = vld [vmem:[%s1027_s4] sm:$0x3f] (!%p190_p9)  ;;  %vm290_vm2 = vcmask (!%p190_p9), 523264  }
  0x13   : > { %689 = vmatpush3.bf16.msra.mxu0 (!%p190_p9), %v740_v4  ;;  %v660_v22 = vld [vmem:[%s1025_s2] ss:$0 sm:$0xff] (!%p190_p9)  ;;  %s213_s10 = sand.u32 (!%p190_p9), 1, %s810_s19  }
  0x14   : > { %443 = vmatprep.subr.bf16.mxu0 (!%p190_p9), %v746_v8  ;;  %405 = vmatpush1.bf16.msra.mxu1 (!%p190_p9), %v743_v6  ;;  %v314_v19 = vsub.s32 (!%p190_p9), 0, %v313_v18  ;;  %v318_v21 = vsub.s32 (!%p190_p9), 1, %v313_v18  ;;  %v322_v28 = vsub.s32 (!%p190_p9), 2, %v313_v18  ;;  %v326_v31 = vsub.s32 (!%p190_p9), 3, %v313_v18  ;;  %s658_s11 = sshll.u32 (!%p190_p9), %s213_s10, 3 }
  0x15   : > { %s217_s13 = scalar_select %p216_p10, %s875_s22, 1  ;;  %484 = vmatprep.subr.bf16.mxu1 %v749_v11  ;;  %v330_v36 = vsub.s32 4, %v313_v18  ;;  %v334_v39 = vsub.s32 5, %v313_v18 }
  0x16   : > { %v315_v23 = vrot.slane %v310_v20, %v314_v19  ;;  %v319_v25 = vrot.slane %v310_v20, %v318_v21  ;;  %v323_v43 = vrot.slane %v310_v20, %v322_v28  ;;  %v327_v46 = vrot.slane %v310_v20, %v326_v31  ;;  %s964_s12 = scalar_lea.vmem [#allocation2], %s658_s11 }
  0x17   : > { %s659_s23 = sshll.u32 %s217_s13, 2  ;;  %v331_v48 = vrot.slane %v310_v20, %v330_v36  ;;  %v335_v52 = vrot.slane %v310_v20, %v334_v39  ;;  %s680_s13 = sshll.u32 %s875_s22, 7 }
  0x18   : > { %s219_s7 = scalar_lea.vmem %s1023_s0, %s659_s23  ;;  %s595_s14 = sshll.u32 %s964_s12, 4  ;;  %s980_s14 = int_to_ptr.vmem [resolvable:$true] %s595_s14 }
  0x19   : > { %v221_v10 = vld [vmem:[%s219_s7] sm:$0xf]  ;;  %s978_s17 = scalar_lea.hbm %s1028_s5, %s680_s13  ;;  %s582_s23 = scalar_lea.sflag [#allocation3], %s213_s10 }
  0x1a   : > { %691 = vmatmul.mubr.msk.bf16.vlgmr.msra.gmra.mrb[0].mxu0 %vm245_vm1, %v221_v10  ;;  %676 = vmatmul.mubr.msk.bf16.vlgmr.msra.gmra.mrb[0].mxu1 %vm245_vm1, %v221_v10  ;;  %s756_s25 = scalar_lea.vmem %s980_s14, 128  ;;  %s823_s22 = smov [#allocation2]  }
  0x1b   : > { %444 = vmatpush1.bf16.msra.mxu0 %v744_v9  ;;  %475 = vmatprep.mubr.bf16.mxu0 %v822_v7  ;;  %p757_p11 = scmp.ne.s32.totalorder %s980_s14, %s756_s25  ;;  %s760_s26 = sshll.u32 %s823_s22, 4  ;;  %s761_s26 = int_to_ptr.vmem [resolvable:$false] %s760_s26 }
  0x1c   : > { %445 = vmatprep.subr.bf16.mxu0 %v752_v13  ;;  %485 = vmatpush1.bf16.msra.mxu1 %v747_v12  ;;  %s762_s30 = scalar_lea.vmem %s761_s26, 256  ;;  %p763_p0 = scmp.lt.s32.totalorder %s980_s14, %s761_s26 }
  0x1d   : > { %516 = vmatprep.mubr.bf16.mxu1 %v822_v7  ;;  %486 = vmatprep.subr.bf16.mxu1 %v755_v15  ;;  %p758_p12 = pnand %p757_p11, %p892_p5  ;;  %p764_p1 = scmp.lt.s32.totalorder %s762_s30, %s756_s25 }
  0x1f   : > { %446 = vmatpush1.bf16.msra.mxu0 %v750_v14  ;;  %p759_p13 = pneg %p758_p12  ;;  %p765_p2 = por %p764_p1, %p763_p0 }
  0x20   : > { %487 = vmatpush1.bf16.msra.mxu1 %v753_v16 }
  0x21   : > { %p766_p3 = pnand %p765_p2, %p759_p13 }
  0x22   : > { %677 = vmatmul.mubr.msk.bf16.vlgmr.msra.gmra.mrb[4].mxu0 %vm245_vm1, %v221_v10 }
  0x23   : > { %678 = vmatmul.mubr.msk.bf16.vlgmr.msra.gmra.mrb[4].mxu1 %vm245_vm1, %v221_v10 }
  0xed   : > { %v283_v24 = vpop.f32.mrb[0].mxu0  ;;  %v436_v29 = vpop.f32.mrb[0].mxu1 }
  0xee   : > { %v284_v26 = vadd.f32 %v660_v22, %v283_v24  ;;  %v692_v27 = vpop.f32.mrb[1].mxu0  ;;  %v437_v33 = vadd.f32 %v436_v29, %v315_v23  ;;  %v438_v34 = vpop.f32.mrb[1].mxu1 }
  0xef   : > { %v286_v30 = vpop.f32.mrb[2].mxu0  ;;  %v439_v37 = vadd.f32 %v438_v34, %v319_v25  ;;  %v440_v38 = vpop.f32.mrb[2].mxu1 }
  0xf0   : > { %v289_v32 = vmax.f32 %v284_v26, 0.0  ;;  %v693_v35 = vpop.f32.mrb[3].mxu0  ;;  %v525_v41 = vmax.f32 %v437_v33, 0.0  ;;  %v441_v42 = vpop.f32.mrb[3].mxu1 }
  0xf1   : > { %v526_v45 = vmax.f32 %v439_v37, 0.0 }
  0xf2   : > { %v291_v40 = vsel %vm290_vm2, %v289_v32, -inf  ;;  %v531_v47 = vrot.slane %v525_v41, 4 }
  0xf3   : > { %v292_v44 = vrot.slane %v291_v40, 4  ;;  %v538_v50 = vrot.slane %v526_v45, 4 }
  0xf4   : > { %v532_v53 = vmax.f32 %v525_v41, %v531_v47 }
  0xf5   : > { %v293_v49 = vmax.f32 %v291_v40, %v292_v44  ;;  %v477_v51 = vpop.f32.mrb[4].mxu0  ;;  %v539_v57 = vmax.f32 %v526_v45, %v538_v50 }
  0xf6   : > { %v478_v54 = vadd.f32 %v477_v51, %v323_v43  ;;  %v479_v55 = vpop.f32.mrb[5].mxu0  ;;  %v518_v59 = vpop.f32.mrb[4].mxu1  ;;  %v533_v61 = vrot.slane %v532_v53, 2 }
  0xf7   : > { %v294_v56 = vrot.slane %v293_v49, 2  ;;  %v480_v58 = vadd.f32 %v479_v55, %v327_v46  ;;  %v481_v60 = vpop.f32.mrb[6].mxu0  ;;  %v519_v63 = vadd.f32 %v518_v59, %v331_v48  ;;  %v520_v0 = vpop.f32.mrb[5].mxu1  ;;  %v540_v3 = vrot.slane %v539_v57, 2 }
  0xf8   : > { %v527_v62 = vmax.f32 %v478_v54, 0.0  ;;  %v482_v1 = vpop.f32.mrb[7].mxu0  ;;  %v521_v5 = vadd.f32 %v520_v0, %v335_v52  ;;  %v522_v6 = vpop.f32.mrb[6].mxu1  ;;  %v534_v7 = vmax.f32 %v532_v53, %v533_v61 }
  0xf9   : > { %v295_v2 = vmax.f32 %v293_v49, %v294_v56  ;;  %v528_v4 = vmax.f32 %v480_v58, 0.0  ;;  %v529_v9 = vmax.f32 %v519_v63, 0.0  ;;  %v523_v10 = vpop.f32.mrb[7].mxu1  ;;  %v541_v12 = vmax.f32 %v539_v57, %v540_v3 }
  0xfa   : > { %v546_v8 = vrot.slane %v527_v62, 4  ;;  %v530_v14 = vmax.f32 %v521_v5, 0.0  ;;  %v535_v15 = vrot.slane %v534_v7, 1 }
  0xfb   : > { %v296_v11 = vrot.slane %v295_v2, 1  ;;  %v554_v13 = vrot.slane %v528_v4, 4  ;;  %v562_v17 = vrot.slane %v529_v9, 4  ;;  %v542_v19 = vrot.slane %v541_v12, 1 }
  0xfc   : > { %v547_v16 = vmax.f32 %v527_v62, %v546_v8  ;;  %v570_v21 = vrot.slane %v530_v14, 4  ;;  %v536_v22 = vmax.f32 %v534_v7, %v535_v15 }
  0xfd   : > { %v297_v18 = vmax.f32 %v295_v2, %v296_v11  ;;  %v555_v20 = vmax.f32 %v528_v4, %v554_v13  ;;  %v563_v24 = vmax.f32 %v529_v9, %v562_v17  ;;  %v543_v26 = vmax.f32 %v541_v12, %v542_v19 }
  0xfe   : > { %v548_v23 = vrot.slane %v547_v16, 2  ;;  %v571_v28 = vmax.f32 %v530_v14, %v570_v21  ;;  %537 = vst [vmem:[%s964_s12] sm:$0x1] %v536_v22 }
  0xff   : > { %v579_v25 = vsel %vm290_vm2, %v297_v18, 0.0  ;;  %v556_v27 = vrot.slane %v555_v20, 2  ;;  %v564_v30 = vrot.slane %v563_v24, 2  ;;  %544 = vst [vmem:[%s964_s12 + $0x1] sm:$0x1] %v543_v26  ;;  %v545_v31 = vmax.f32 %v536_v22, %v543_v26 }
 0x100   : > { %580 = vst [vmem:[%s964_s12 + $0x7] sm:$0x1] %v579_v25  ;;  %v549_v29 = vmax.f32 %v547_v16, %v548_v23  ;;  %v572_v33 = vrot.slane %v571_v28, 2 }
 0x101   : > { %v557_v32 = vmax.f32 %v555_v20, %v556_v27  ;;  %v565_v35 = vmax.f32 %v563_v24, %v564_v30 }
 0x102   : > { %v550_v34 = vrot.slane %v549_v29, 1  ;;  %v573_v37 = vmax.f32 %v571_v28, %v572_v33 }
 0x103   : > { %v558_v36 = vrot.slane %v557_v32, 1  ;;  %v566_v39 = vrot.slane %v565_v35, 1 }
 0x104   : > { %v551_v38 = vmax.f32 %v549_v29, %v550_v34  ;;  %v574_v41 = vrot.slane %v573_v37, 1 }
 0x105   : > { %v559_v40 = vmax.f32 %v557_v32, %v558_v36  ;;  %v567_v43 = vmax.f32 %v565_v35, %v566_v39 }
 0x106   : > { %552 = vst [vmem:[%s964_s12 + $0x2] sm:$0x1] %v551_v38  ;;  %v553_v42 = vmax.f32 %v545_v31, %v551_v38  ;;  %v575_v44 = vmax.f32 %v573_v37, %v574_v41 }
 0x107   : > { %560 = vst [vmem:[%s964_s12 + $0x3] sm:$0x1] %v559_v40  ;;  %568 = vst [vmem:[%s964_s12 + $0x4] sm:$0x1] %v567_v43 }
 0x108   : > { %v561_v45 = vmax.f32 %v553_v42, %v559_v40  ;;  %576 = vst [vmem:[%s964_s12 + $0x5] sm:$0x1] %v575_v44 }
 0x10a   : > { %v569_v46 = vmax.f32 %v561_v45, %v567_v43 }
 0x10c   : > { %v577_v47 = vmax.f32 %v569_v46, %v575_v44 }
 0x10e   : > { %578 = vst [vmem:[%s964_s12 + $0x6] sm:$0x1] %v577_v47 }
 0x10f   : > { %769 = shalt.err (!%p766_p3)
}
 0x110   : > { %s770_s6 = scalar_lea.hbm %s978_s17, 128  ;;  %s774_s9 = scalar_lea.hbm %s1028_s5, 256 }
 0x111   : > { %p771_p4 = scmp.ne.s32.totalorder %s978_s17, %s770_s6  ;;  %p775_p9 = scmp.lt.u32.totalorder %s978_s17, %s1028_s5 }
 0x112   : > { %p776_p10 = scmp.lt.u32.totalorder %s774_s9, %s770_s6  ;;  %p778_p12 = scmp.lt.u32.totalorder %s770_s6, %s978_s17 }
 0x113   : > { %p772_p7 = pnand %p771_p4, %p892_p5 }
 0x114   : > { %p777_p11 = por %p776_p10, %p775_p9 }
 0x115   : > { %p773_p8 = pneg %p772_p7 }
 0x116   : > { %p779_p13 = por %p778_p12, %p777_p11 }
 0x118   : > { %p780_p0 = pnand %p779_p13, %p773_p8 }
 0x11a   : > { %783 = shalt.err (!%p780_p0)
}
 0x11b   : > { %694 = dma.vmem_to_hbm [thread:$0]  (%p892_p5), %s980_s14, 128, %s978_s17, %s582_s23  }
 0x11c PF: > { %p700_p1 = scmp.ge.s32.totalorder %s818_s21, 2  ;;  %s607_s12 = sand.u32 1, %s806_s18  }
 0x11d   : > { %s608_s13 = scalar_lea.sflag [#allocation3], %s607_s12 }
 0x11e   : > { %p697_p2 = pnand %p700_p1, %p896_p6 }
 0x120   : > { %801 = dma.done.wait (!%p697_p2), %s608_s13, 128  }
 0x121   : > { %803 = vsyncadd (!%p697_p2), %s608_s13, 4294967168  ;;  %p15_p3 = scmp.ge.s32.totalorder %s879_s24, 4   ;;  %s1031_s18 = smov %s810_s19 }
 0x122   : > { %s1032_s19 = smov %s814_s20  ;;  %s1033_s20 = smov %s890_s27 }
 0x123   : > { %s1034_s21 = smov %s879_s24  ;;  %17 = sbr.rel (!%p15_p3) target bundleno = 3 (0x3), region = 75 }
 0x12a   :  { %613 = vsyncpa [#allocation3], 1 }
 0x12b   :  { %615 = vsyncpa [#allocation3 + $0x1], 1 }

</bundles_post_ra>
